<compile_context>
chip_gen: v7x
topology: tpu7x:2x2x1
jax: 0.10.0
libtpu: 0.0.40
codegen_flags: <defaults>
</compile_context>

<pallas_src>
import jax
import jax.numpy as jnp
from jax.experimental import pallas as pl
from jax.experimental.pallas import tpu as pltpu

INPUT_DIM = 768  # fixed by the module (input_dim=768)


def _attention_pool_kernel(x_ref, w_ref, b_ref, o_ref):
    # x_ref: (TB, L, D) VMEM    w_ref: (1, D) VMEM (lane-dense)
    # b_ref: (1,)      SMEM     o_ref: (TB, D) VMEM
    x = x_ref[...]                                     # (TB, L, D)
    w = w_ref[...]                                     # (1, D) -> broadcasts over (TB, L, D)

    # Linear(D -> 1): VPU multiply + lane reduce (no 1-column MXU matmul).
    scores = jnp.sum(x * w, axis=-1, keepdims=True)    # (TB, L, 1)
    scores = scores + b_ref[0]                         # scalar bias from SMEM

    # Numerically-stable softmax over the sequence axis (dim=1 in PyTorch).
    m = jnp.max(scores, axis=1, keepdims=True)         # (TB, 1, 1)
    e = jnp.exp(scores - m)                            # (TB, L, 1)
    denom = jnp.sum(e, axis=1, keepdims=True)          # (TB, 1, 1)
    p = e / denom                                      # exact divide (tiny array)

    # Weighted sum over L: broadcast p over D, reduce over the sequence axis.
    o_ref[...] = jnp.sum(p * x, axis=1).astype(o_ref.dtype)   # (TB, D)


def _tile_config(B, L, D, itemsize):
    """Pick (tb, vmem_limit_bytes) per chip generation.

    tb is either the full batch B (block == full array dim, always legal) or a
    multiple of 8 (sublane-legal output block).  No input padding is needed:
    a ragged final tile relies on Pallas's OOB block masking.
    """
    try:
        vmem_cap = int(pltpu.get_tpu_info().vmem_capacity_bytes)
    except Exception:
        vmem_cap = 64 << 20  # conservative (v7x-sized) default
    if vmem_cap >= (96 << 20):
        # v5e / v6e: 128 MiB VMEM, single TensorCore -> big tiles, few steps.
        target_bytes, vmem_limit = 12 << 20, 64 << 20
    else:
        # v7x (64 MiB VMEM) or unknown: modest tiles, leave headroom.
        target_bytes, vmem_limit = 4 << 20, 28 << 20

    row_bytes = L * D * itemsize
    tb = max(1, target_bytes // row_bytes)
    if tb >= B:
        return int(B), vmem_limit          # single step, block == full array
    tb = max(8, (tb // 8) * 8)             # sublane-legal tile
    return int(min(tb, B)), vmem_limit


def chemberta_decoder(x, w_attn, b_attn):
    """x: (B, L, D) float32; w_attn: (D, 1); b_attn: (1,). Returns (B, D)."""
    B, L, D = x.shape
    assert D == INPUT_DIM

    # Lane-dense weight layout: (D, 1) -> (1, D); scalar bias -> SMEM operand.
    w_row = jnp.reshape(w_attn, (1, D)).astype(x.dtype)
    b = jnp.reshape(b_attn, (1,)).astype(jnp.float32)

    tb, vmem_limit = _tile_config(B, L, D, x.dtype.itemsize)
    n_steps = pl.cdiv(B, tb)

    itemsize = x.dtype.itemsize
    cost = pl.CostEstimate(
        flops=4 * B * L * D,                                   # dot + weighted sum
        transcendentals=B * L,                                 # exp
        bytes_accessed=(B * L * D + B * D + D) * itemsize,     # x in, out, w
    )

    out = pl.pallas_call(
        _attention_pool_kernel,
        out_shape=jax.ShapeDtypeStruct((B, D), x.dtype),
        grid_spec=pltpu.PrefetchScalarGridSpec(
            num_scalar_prefetch=0,
            grid=(n_steps,),
            in_specs=[
                pl.BlockSpec((tb, L, D), lambda i: (i, 0, 0)),
                pl.BlockSpec((1, D), lambda i: (0, 0)),
                pl.BlockSpec(memory_space=pltpu.MemorySpace.SMEM),
            ],
            out_specs=pl.BlockSpec((tb, D), lambda i: (i, 0)),
        ),
        compiler_params=pltpu.CompilerParams(
            dimension_semantics=("parallel",),
            vmem_limit_bytes=vmem_limit,
        ),
        cost_estimate=cost,
    )(x, w_row, b)

    # x.view(x.size(0), -1) on a (B, D) tensor is the identity.
    return out.reshape(B, -1)


def _reference(x, w_attn, b_attn):
    scores = jnp.einsum("bld,do->blo", x, w_attn) + b_attn[0]  # (B, L, 1)
    p = jax.nn.softmax(scores, axis=1)
    return jnp.sum(p * x, axis=1)  # (B, D)


if __name__ == "__main__":
    B, L, D = 2, 8, INPUT_DIM  # max_len = 8 for this synthetic run
    key = jax.random.PRNGKey(0)
    kx, kw, kb = jax.random.split(key, 3)

    x = jax.random.normal(kx, (B, L, D), dtype=jnp.float32)
    # Deterministic "Linear(768, 1)" parameters (synthetic init).
    w_attn = jax.random.normal(kw, (D, 1), dtype=jnp.float32) * 0.02
    b_attn = jax.random.normal(kb, (1,), dtype=jnp.float32) * 0.02

    out = jax.block_until_ready(chemberta_decoder(x, w_attn, b_attn))

    ref = _reference(x, w_attn, b_attn)
    assert out.shape == (B, D)
    assert jnp.allclose(out, ref, atol=1e-4, rtol=1e-4), "mismatch vs reference"
    print("KERNEL_OK")
</pallas_src>

<mosaic_0001>
module attributes {stable_mosaic.version = 11 : i64} {
  func.func @_attention_pool_kernel(%arg0: i32, %arg1: memref<2x8x768xf32, #tpu.memory_space<vmem>>, %arg2: memref<1x768xf32, #tpu.memory_space<vmem>>, %arg3: memref<1xf32, #tpu.memory_space<smem>>, %arg4: memref<2x768xf32, #tpu.memory_space<vmem>>) attributes {dimension_semantics = [#tpu.dimension_semantics<parallel>], iteration_bounds = array<i64: 1>, scalar_prefetch = 0 : i64, scratch_operands = 0 : i64, tpu.core_type = #tpu.core_type<tc>, window_params = [{transform_indices = @transform_0, window_bounds = array<i64: 2, 8, 768>}, {pipeline_mode = #tpu.pipeline_mode<synchronous>, transform_indices = @transform_1, window_bounds = array<i64: 1, 768>}, {transform_indices = @transform_2, window_bounds = array<i64: 1>}, {transform_indices = @transform_3, window_bounds = array<i64: 2, 768>}]} {
    %c0 = arith.constant 0 : index
    %c0_0 = arith.constant 0 : index
    %c0_1 = arith.constant 0 : index
    %0 = vector.load %arg1[%c0, %c0_0, %c0_1] : memref<2x8x768xf32, #tpu.memory_space<vmem>>, vector<2x8x768xf32>
    %c0_2 = arith.constant 0 : index
    %c0_3 = arith.constant 0 : index
    %1 = vector.load %arg2[%c0_2, %c0_3] : memref<1x768xf32, #tpu.memory_space<vmem>>, vector<1x768xf32>
    %2 = vector.shape_cast %1 : vector<1x768xf32> to vector<1x1x768xf32>
    %3 = vector.broadcast %2 : vector<1x1x768xf32> to vector<2x8x768xf32>
    %4 = arith.mulf %0, %3 : vector<2x8x768xf32>
    %cst = arith.constant dense<0.000000e+00> : vector<2x8xf32>
    %5 = vector.multi_reduction <add>, %4, %cst [2] : vector<2x8x768xf32> to vector<2x8xf32>
    %6 = vector.shape_cast %5 : vector<2x8xf32> to vector<2x8x1xf32>
    %c0_4 = arith.constant 0 : index
    %7 = memref.load %arg3[%c0_4] : memref<1xf32, #tpu.memory_space<smem>>
    %8 = vector.broadcast %7 : f32 to vector<2x8x1xf32>
    %9 = arith.addf %6, %8 : vector<2x8x1xf32>
    %cst_5 = arith.constant dense<0xFF800000> : vector<2x1xf32>
    %10 = vector.multi_reduction <maximumf>, %9, %cst_5 [1] : vector<2x8x1xf32> to vector<2x1xf32>
    %11 = vector.shape_cast %10 : vector<2x1xf32> to vector<2x1x1xf32>
    %12 = vector.broadcast %11 : vector<2x1x1xf32> to vector<2x8x1xf32>
    %13 = arith.subf %9, %12 : vector<2x8x1xf32>
    %14 = math.exp %13 : vector<2x8x1xf32>
    %cst_6 = arith.constant dense<0.000000e+00> : vector<2x1xf32>
    %15 = vector.multi_reduction <add>, %14, %cst_6 [1] : vector<2x8x1xf32> to vector<2x1xf32>
    %16 = vector.shape_cast %15 : vector<2x1xf32> to vector<2x1x1xf32>
    %17 = vector.broadcast %16 : vector<2x1x1xf32> to vector<2x8x1xf32>
    %18 = arith.divf %14, %17 : vector<2x8x1xf32>
    %19 = vector.broadcast %18 : vector<2x8x1xf32> to vector<2x8x768xf32>
    %20 = arith.mulf %19, %0 : vector<2x8x768xf32>
    %cst_7 = arith.constant dense<0.000000e+00> : vector<2x768xf32>
    %21 = vector.multi_reduction <add>, %20, %cst_7 [1] : vector<2x8x768xf32> to vector<2x768xf32>
    %c0_8 = arith.constant 0 : index
    %c0_9 = arith.constant 0 : index
    %22 = vector.load %arg4[%c0_8, %c0_9] : memref<2x768xf32, #tpu.memory_space<vmem>>, vector<2x768xf32>
    tpu.vector_store %arg4[%c0_8, %c0_9], %21 {strides = array<i32>} : memref<2x768xf32, #tpu.memory_space<vmem>>, vector<2x768xf32>,
    return
  }
  func.func @transform_0(%arg0: i32) -> (i32, i32, i32) {
    %c0_i32 = arith.constant 0 : i32
    %c0_i32_0 = arith.constant 0 : i32
    %c0_i32_1 = arith.constant 0 : i32
    return %arg0, %c0_i32, %c0_i32_0 : i32, i32, i32
  }
  func.func @transform_1(%arg0: i32) -> (i32, i32) {
    %c0_i32 = arith.constant 0 : i32
    %c0_i32_0 = arith.constant 0 : i32
    %c0_i32_1 = arith.constant 0 : i32
    return %c0_i32, %c0_i32_0 : i32, i32
  }
  func.func @transform_2(%arg0: i32) -> i32 {
    %c0_i32 = arith.constant 0 : i32
    %c0_i32_0 = arith.constant 0 : i32
    return %c0_i32 : i32
  }
  func.func @transform_3(%arg0: i32) -> (i32, i32) {
    %c0_i32 = arith.constant 0 : i32
    %c0_i32_0 = arith.constant 0 : i32
    return %arg0, %c0_i32 : i32, i32
  }
}

</mosaic_0001>

<bundles_post_ra>
// kernel: tpu_custom_call.1
= control target key start
LH: loop header
LB: loop body
LE: loop exit
PB: predicated region body
PF: predicated region fallthrough
CT: control target
= control target key end

     0   :  { %9 = vsyncpa [#allocation4], 0  ;;  %s499_s0 = inlined_call_operand.hbm [shape: f32[2,8,768], index: 0, kind: input, shape index: {}]   ;;  %s500_s1 = inlined_call_operand.vmem [shape: f32[1,768], index: 1, kind: input, shape index: {}]   ;;  %s501_s2 = inlined_call_operand.<no memory space> [shape: f32[1], index: 2, kind: input, shape index: {}]   ;;  %s502_s3 = inlined_call_operand.hbm [shape: f32[2,768], index: 3, kind: output, shape index: {}]  }
   0x1   :  { %10 = vsyncpa [#allocation5], 0  ;;  %s384_s12 = smov [#allocation3]   ;;  %s336_s16 = scalar_lea.hbm %s499_s0, 1536 }
   0x2   :  { %s16_s13 = sshll.u32 %s384_s12, 4  ;;  %p337_p0 = scmp.ne.s32.totalorder %s499_s0, %s336_s16  ;;  %s17_s13 = int_to_ptr.vmem [resolvable:$true] %s16_s13 }
   0x3   :  { %p340_p1 = scmp.lt.u32.totalorder %s336_s16, %s499_s0 }
   0x5   :  { %p342_p2 = pnand %p340_p1, %p337_p0 }
   0x7   :  { %345 = shalt.err (!%p342_p2)
}
   0x8   :  { %s346_s21 = scalar_lea.vmem %s17_s13, 1536  ;;  %p351_p4 = scmp.lt.s32.totalorder %s17_s13, %s17_s13 }
   0x9   :  { %p347_p3 = scmp.ne.s32.totalorder %s17_s13, %s346_s21  ;;  %p352_p5 = scmp.lt.s32.totalorder %s346_s21, %s346_s21 }
   0xb   :  { %p353_p6 = por %p352_p5, %p351_p4 }
   0xd   :  { %p354_p7 = pnand %p353_p6, %p347_p3 }
   0xf   :  { %357 = shalt.err (!%p354_p7)
}
  0x10   :  { %s385_s22 = smov 768   ;;  %s386_s23 = smov 48  }
  0x11   :  { %22 = dma.hbm_to_vmem [thread:$0]  %s499_s0, 1536, %s17_s13, [#allocation4], %s385_s22, %s385_s22, %s386_s23  }
  0x12   :  { %380 = dma.done.wait [#allocation4], 1536  }
  0x13   :  { %381 = vsyncadd [#allocation4], 4294965760  ;;  %v44_v0 = vlaneseq  ;;  %v427_v6 = vld [vmem:[#allocation3 + $0x30] sm:$0xff]  ;;  %v430_v8 = vld [vmem:[#allocation3 + $0x38] sm:$0xff]  ;;  %v101_v49 = vstv %s501_s2  ;;  %vm289_vm0 = vcmask 1041409   ;;  %vm291_vm1 = vcmask 1043459  }
  0x14   :  { %v432_v9 = vld [vmem:[#allocation3 + $0x40] sm:$0xff]  ;;  %v440_v17 = vld [vmem:[#allocation3 + $0x8] sm:$0xff]  ;;  %v444_v19 = vld [vmem:[#allocation3 + $0x10] sm:$0xff]  ;;  %vm293_vm2 = vcmask 1045509   ;;  %s388_s2 = smov [#allocation6]   ;;  %vm295_vm3 = vcmask 1047559  }
  0x15   :  { %v421_v1 = vshrl.u32 %v44_v0, 7  ;;  %v42_v10 = vld [vmem:[%s500_s1] sm:$0x3f]  ;;  %v442_v18 = vld [vmem:[#allocation3 + $0x48] sm:$0xff]  ;;  %v449_v24 = vld [vmem:[#allocation3 + $0x18] sm:$0xff]  ;;  %s314_s28 = sshll.u32 %s388_s2, 4  ;;  %s315_s28 = int_to_ptr.vmem [resolvable:$true] %s314_s28 }
  0x16   :  { %v438_v16 = vld [vmem:[#allocation3] sm:$0xff]  ;;  %v451_v25 = vld [vmem:[#allocation3 + $0x50] sm:$0xff]  ;;  %v459_v33 = vld [vmem:[#allocation3 + $0x58] sm:$0xff]  ;;  %s358_s29 = scalar_lea.vmem %s315_s28, 192  ;;  %p363_p9 = scmp.lt.s32.totalorder %s315_s28, %s315_s28 }
  0x17   :  { %v46_v2 = vsub.s32 0, %v421_v1  ;;  %v50_v3 = vsub.s32 1, %v421_v1  ;;  %v54_v4 = vsub.s32 2, %v421_v1  ;;  %v58_v5 = vsub.s32 3, %v421_v1  ;;  %v456_v31 = vld [vmem:[#allocation3 + $0x20] sm:$0xff]  ;;  %v463_v38 = vld [vmem:[#allocation3 + $0x28] sm:$0xff]  ;;  %p359_p8 = scmp.ne.s32.totalorder %s315_s28, %s358_s29  ;;  %p364_p10 = scmp.lt.s32.totalorder %s358_s29, %s358_s29 }
  0x18   :  { %v62_v7 = vsub.s32 4, %v421_v1  ;;  %v66_v11 = vsub.s32 5, %v421_v1 }
  0x19   :  { %v47_v12 = vrot.slane %v42_v10, %v46_v2  ;;  %v51_v13 = vrot.slane %v42_v10, %v50_v3  ;;  %v55_v14 = vrot.slane %v42_v10, %v54_v4  ;;  %v59_v15 = vrot.slane %v42_v10, %v58_v5  ;;  %p365_p11 = por %p364_p10, %p363_p9 }
  0x1a   :  { %v63_v20 = vrot.slane %v42_v10, %v62_v7  ;;  %v67_v28 = vrot.slane %v42_v10, %v66_v11 }
  0x1b   :  { %v80_v21 = vmul.f32 %v47_v12, %v427_v6  ;;  %v81_v22 = vmul.f32 %v51_v13, %v430_v8  ;;  %v82_v23 = vmul.f32 %v55_v14, %v432_v9  ;;  %v74_v26 = vmul.f32 %v47_v12, %v438_v16  ;;  %p366_p12 = pnand %p365_p11, %p359_p8 }
  0x1c   :  { %v75_v27 = vmul.f32 %v51_v13, %v440_v17  ;;  %v83_v29 = vmul.f32 %v59_v15, %v442_v18  ;;  %v76_v32 = vmul.f32 %v55_v14, %v444_v19  ;;  %v77_v34 = vmul.f32 %v59_v15, %v449_v24 }
  0x1d   :  { %v93_v30 = vadd.f32 %v81_v22, %v80_v21  ;;  %v84_v36 = vmul.f32 %v63_v20, %v451_v25  ;;  %v78_v39 = vmul.f32 %v63_v20, %v456_v31  ;;  %v85_v41 = vmul.f32 %v67_v28, %v459_v33 }
  0x1e   :  { %v86_v35 = vadd.f32 %v75_v27, %v74_v26  ;;  %v79_v45 = vmul.f32 %v67_v28, %v463_v38 }
  0x1f   :  { %v94_v37 = vadd.f32 %v93_v30, %v82_v23 }
  0x20   :  { %v87_v40 = vadd.f32 %v86_v35, %v76_v32 }
  0x21   :  { %v95_v42 = vadd.f32 %v94_v37, %v83_v29 }
  0x22   :  { %v88_v43 = vadd.f32 %v87_v40, %v77_v34 }
  0x23   :  { %v96_v44 = vadd.f32 %v95_v42, %v84_v36 }
  0x24   :  { %v89_v46 = vadd.f32 %v88_v43, %v78_v39  ;;  %v387_v43 = vmov 1983009808  }
  0x25   :  { %v97_v47 = vadd.f32 %v96_v44, %v85_v41  ;;  %v475_v44 = vunpack.c.l.s4 %v387_v43 }
  0x26   :  { %v90_v48 = vadd.f32 %v89_v46, %v79_v45 }
  0x27   :  { %98 = vadd.xlane.f32.xlu0 %v97_v47 }
  0x2b   :  { %91 = vadd.xlane.f32.xlu0 %v90_v48 }
  0xb4   :  { %v99_v50 = vpop.xlane.xlu0 %98 }
  0xb5   :  { %v103_v51 = vadd.f32 %v101_v49, %v99_v50 }
  0xb7   :  { %v110_v52 = vrot.slane %v103_v51, 4 }
  0xb8   :  { %v92_v53 = vpop.xlane.xlu0 %91 }
  0xb9   :  { %v111_v54 = vmax.f32 %v103_v51, %v110_v52  ;;  %v102_v55 = vadd.f32 %v101_v49, %v92_v53 }
  0xbb   :  { %v112_v56 = vrot.slane %v111_v54, 2  ;;  %v104_v57 = vrot.slane %v102_v55, 4 }
  0xbd   :  { %v113_v58 = vmax.f32 %v111_v54, %v112_v56  ;;  %v105_v59 = vmax.f32 %v102_v55, %v104_v57 }
  0xbf   :  { %v114_v60 = vrot.slane %v113_v58, 1  ;;  %v106_v61 = vrot.slane %v105_v59, 2 }
  0xc1   :  { %v115_v62 = vmax.f32 %v113_v58, %v114_v60  ;;  %v107_v63 = vmax.f32 %v105_v59, %v106_v61 }
  0xc3   :  { %v117_v0 = vsub.f32 %v103_v51, %v115_v62  ;;  %v108_v2 = vrot.slane %v107_v63, 1 }
  0xc5   :  { %v120_v3 = vmul.f32 1.442695, %v117_v0  ;;  %v109_v4 = vmax.f32 %v107_v63, %v108_v2 }
  0xc7   :  { %328 = vpow2.f32 %v120_v3  ;;  %v116_v5 = vsub.f32 %v102_v55, %v109_v4 }
  0xc9   :  { %v118_v7 = vmul.f32 1.442695, %v116_v5 }
  0xcb   :  { %330 = vpow2.f32 %v118_v7 }
  0xd1   :  { %v329_v10 = vpop.eup %328 }
  0xd2   :  { %v128_v11 = vrot.slane %v329_v10, 4 }
  0xd4   :  { %v129_v12 = vadd.f32 %v329_v10, %v128_v11 }
  0xd5   :  { %v331_v13 = vpop.eup %330 }
  0xd6   :  { %v130_v14 = vrot.slane %v129_v12, 2  ;;  %v122_v15 = vrot.slane %v331_v13, 4 }
  0xd8   :  { %v131_v20 = vadd.f32 %v130_v14, %v129_v12  ;;  %v123_v21 = vadd.f32 %v331_v13, %v122_v15 }
  0xda   :  { %v132_v22 = vrot.slane %v131_v20, 1  ;;  %v124_v23 = vrot.slane %v123_v21, 2 }
  0xdc   :  { %v133_v26 = vadd.f32 %v132_v22, %v131_v20  ;;  %v125_v27 = vadd.f32 %v124_v23, %v123_v21 }
  0xde   :  { %332 = vrcp.f32 %v133_v26  ;;  %v126_v28 = vrot.slane %v125_v27, 1 }
  0xe0   :  { %v127_v29 = vadd.f32 %v126_v28, %v125_v27 }
  0xe2   :  { %334 = vrcp.f32 %v127_v29  ;;  %v238_v29 = vunpack.c.0.s8 %v475_v44 }
  0xe8   :  { %v333_v30 = vpop.eup %332 }
  0xe9   :  { %v137_v32 = vmul.f32 %v333_v30, %v329_v10 }
  0xeb   :  { %v144_v34 = vmul.f32 %v137_v32, %v427_v6  ;;  %v145_v35 = vmul.f32 %v137_v32, %v430_v8  ;;  %v146_v36 = vmul.f32 %v137_v32, %v432_v9  ;;  %v147_v37 = vmul.f32 %v137_v32, %v442_v18 }
  0xec   :  { %v335_v39 = vpop.eup %334  ;;  %v148_v45 = vmul.f32 %v137_v32, %v451_v25  ;;  %v149_v46 = vmul.f32 %v137_v32, %v459_v33 }
  0xed   :  { %v135_v40 = vmul.f32 %v335_v39, %v331_v13  ;;  %v186_v41 = vrot.slane %v144_v34, 4  ;;  %v192_v42 = vrot.slane %v145_v35, 4  ;;  %v198_v47 = vrot.slane %v146_v36, 4 }
  0xee   :  { %v204_v48 = vrot.slane %v147_v37, 4  ;;  %v210_v15 = vrot.slane %v148_v45, 4  ;;  %v216_v20 = vrot.slane %v149_v46, 4 }
  0xef   :  { %v138_v6 = vmul.f32 %v135_v40, %v438_v16  ;;  %v139_v8 = vmul.f32 %v135_v40, %v440_v17  ;;  %v140_v9 = vmul.f32 %v135_v40, %v444_v19  ;;  %v141_v18 = vmul.f32 %v135_v40, %v449_v24 }
  0xf0   :  { %v142_v49 = vmul.f32 %v135_v40, %v456_v31  ;;  %v143_v50 = vmul.f32 %v135_v40, %v463_v38  ;;  %v187_v51 = vadd.f32 %v186_v41, %v144_v34  ;;  %v193_v52 = vadd.f32 %v192_v42, %v145_v35 }
  0xf1   :  { %v150_v53 = vrot.slane %v138_v6, 4  ;;  %v156_v25 = vrot.slane %v139_v8, 4  ;;  %v162_v54 = vrot.slane %v140_v9, 4  ;;  %v168_v33 = vrot.slane %v141_v18, 4 }
  0xf2   :  { %v174_v55 = vrot.slane %v142_v49, 4  ;;  %v180_v56 = vrot.slane %v143_v50, 4  ;;  %v188_v57 = vrot.slane %v187_v51, 2  ;;  %v194_v16 = vrot.slane %v193_v52, 2 }
  0xf3   :  { %v151_v58 = vadd.f32 %v150_v53, %v138_v6  ;;  %v157_v17 = vadd.f32 %v156_v25, %v139_v8  ;;  %v163_v59 = vadd.f32 %v162_v54, %v140_v9  ;;  %v169_v19 = vadd.f32 %v168_v33, %v141_v18 }
  0xf4   :  { %v175_v60 = vadd.f32 %v174_v55, %v142_v49  ;;  %v181_v24 = vadd.f32 %v180_v56, %v143_v50  ;;  %v189_v61 = vadd.f32 %v188_v57, %v187_v51  ;;  %v195_v31 = vadd.f32 %v194_v16, %v193_v52 }
  0xf5   :  { %v152_v62 = vrot.slane %v151_v58, 2  ;;  %v158_v38 = vrot.slane %v157_v17, 2  ;;  %v164_v63 = vrot.slane %v163_v59, 2  ;;  %v170_v0 = vrot.slane %v169_v19, 2 }
  0xf6   :  { %v176_v2 = vrot.slane %v175_v60, 2  ;;  %v182_v3 = vrot.slane %v181_v24, 2  ;;  %v190_v4 = vrot.slane %v189_v61, 1  ;;  %v196_v5 = vrot.slane %v195_v31, 1 }
  0xf7   :  { %v153_v7 = vadd.f32 %v152_v62, %v151_v58  ;;  %v159_v10 = vadd.f32 %v158_v38, %v157_v17  ;;  %v165_v11 = vadd.f32 %v164_v63, %v163_v59  ;;  %v171_v12 = vadd.f32 %v170_v0, %v169_v19 }
  0xf8   :  { %v177_v13 = vadd.f32 %v176_v2, %v175_v60  ;;  %v183_v14 = vadd.f32 %v182_v3, %v181_v24  ;;  %v199_v27 = vadd.f32 %v198_v47, %v146_v36  ;;  %v205_v28 = vadd.f32 %v204_v48, %v147_v37 }
  0xf9   :  { %v154_v21 = vrot.slane %v153_v7, 1  ;;  %v160_v22 = vrot.slane %v159_v10, 1  ;;  %v166_v23 = vrot.slane %v165_v11, 1  ;;  %v172_v26 = vrot.slane %v171_v12, 1 }
  0xfa   :  { %v191_v34 = vadd.f32 %v190_v4, %v189_v61  ;;  %v197_v35 = vadd.f32 %v196_v5, %v195_v31  ;;  %v200_v41 = vrot.slane %v199_v27, 2  ;;  %v206_v42 = vrot.slane %v205_v28, 2 }
  0xfb   :  { %v155_v30 = vadd.f32 %v154_v21, %v153_v7  ;;  %v161_v32 = vadd.f32 %v160_v22, %v159_v10  ;;  %v167_v39 = vadd.f32 %v166_v23, %v165_v11  ;;  %v173_v40 = vadd.f32 %v172_v26, %v171_v12 }
  0xfc   :  { %v178_v43 = vrot.slane %v177_v13, 1  ;;  %v184_v6 = vrot.slane %v183_v14, 1  ;;  %v211_v8 = vadd.f32 %v210_v15, %v148_v45  ;;  %v217_v9 = vadd.f32 %v216_v20, %v149_v46 }
  0xfd   :  { %v201_v18 = vadd.f32 %v200_v41, %v199_v27  ;;  %v207_v49 = vadd.f32 %v206_v42, %v205_v28  ;;  %v234_v36 = vcombine.low %v155_v30, %v161_v32  ;;  %v241_v37 = vsub.s32 %v238_v29, %v421_v1 }
  0xfe   :  { %v212_v50 = vrot.slane %v211_v8, 2  ;;  %v218_v51 = vrot.slane %v217_v9, 2  ;;  %v235_v48 = vcombine.low %v167_v39, %v173_v40  ;;  %v259_v52 = vcombine.low %v191_v34, %v197_v35 }
  0xff   :  { %v202_v44 = vrot.slane %v201_v18, 1  ;;  %v208_v47 = vrot.slane %v207_v49, 1  ;;  %v179_v53 = vadd.f32 %v178_v43, %v177_v13  ;;  %v185_v25 = vadd.f32 %v184_v6, %v183_v14 }
 0x100   :  { %v213_v54 = vadd.f32 %v212_v50, %v211_v8  ;;  %v219_v33 = vadd.f32 %v218_v51, %v217_v9  ;;  %v242_v46 = vrot.slane %v234_v36, %v241_v37  ;;  %v249_v16 = vrot.slane %v235_v48, %v241_v37 }
 0x101   :  { %v203_v55 = vadd.f32 %v202_v44, %v201_v18  ;;  %v209_v56 = vadd.f32 %v208_v47, %v207_v49  ;;  %v267_v17 = vrot.slane %v259_v52, %v241_v37  ;;  %v251_v60 = vcombine.low %v179_v53, %v185_v25 }
 0x102   :  { %v214_v57 = vrot.slane %v213_v54, 1  ;;  %v220_v45 = vrot.slane %v219_v33, 1  ;;  %v250_v61 = vcombine.low %v242_v46, %v249_v16 }
 0x103   :  { %v260_v58 = vcombine.low %v203_v55, %v209_v56  ;;  %v258_v62 = vrot.slane %v251_v60, %v241_v37 }
 0x104   :  { %v215_v59 = vadd.f32 %v214_v57, %v213_v54  ;;  %v221_v19 = vadd.f32 %v220_v45, %v219_v33 }
 0x105   :  { %v274_v1 = vrot.slane %v260_v58, %v241_v37 }
 0x106   :  { %v276_v24 = vcombine.low %v215_v59, %v221_v19 }
 0x107   :  { %v275_v31 = vcombine.low %v267_v17, %v274_v1 }
 0x108   :  { %v283_v38 = vrot.slane %v276_v24, %v241_v37 }
 0x109   :  { %v288_v63 = vrot.slane %v275_v31, 7 }
 0x10a   :  { %v299_v0 = vrot.slane %v283_v38, 7 }
 0x10b   :  { %v290_v2 = vsel %vm289_vm0, %v288_v63, %v250_v61 }
 0x10c   :  { %v292_v3 = vsel %vm291_vm1, %v288_v63, %v290_v2  ;;  %v300_v4 = vsel %vm289_vm0, %v299_v0, %v258_v62 }
 0x10d   :  { %v294_v5 = vsel %vm293_vm2, %v288_v63, %v292_v3  ;;  %v301_v7 = vsel %vm291_vm1, %v299_v0, %v300_v4 }
 0x10e   :  { %v296_v10 = vsel %vm295_vm3, %v288_v63, %v294_v5  ;;  %v302_v11 = vsel %vm293_vm2, %v299_v0, %v301_v7 }
 0x10f   :  { %v303_v12 = vsel %vm295_vm3, %v299_v0, %v302_v11  ;;  %306 = vst [vmem:[#allocation6] sm:$0xff] %v296_v10 }
 0x110   :  { %307 = vst [vmem:[#allocation6 + $0x8] sm:$0xf] %v303_v12 }
 0x111   :  { %369 = shalt.err (!%p366_p12)
}
 0x112   :  { %s370_s5 = scalar_lea.hbm %s502_s3, 192 }
 0x113   :  { %p371_p13 = scmp.ne.s32.totalorder %s502_s3, %s370_s5  ;;  %p374_p0 = scmp.lt.u32.totalorder %s370_s5, %s502_s3 }
 0x115   :  { %p376_p1 = pnand %p374_p0, %p371_p13 }
 0x117   :  { %379 = shalt.err (!%p376_p1)
}
 0x118   :  { %317 = dma.vmem_to_hbm [thread:$0]  %s315_s28, 192, %s502_s3, [#allocation5]  }
 0x119   :  { %382 = dma.done.wait [#allocation5], 192  }
 0x11a   :  { %383 = vsyncadd [#allocation5], 4294967104 }
 0x11b   :  { %321 = vsyncpa [#allocation4], 1 }
 0x11c   :  { %322 = vsyncpa [#allocation5], 1 }

</bundles_post_ra>
